<compile_context>
chip_gen: v7x
topology: tpu7x:2x2x1
jax: 0.10.0
libtpu: 0.0.40
codegen_flags: <defaults>
</compile_context>

<pallas_src>
import functools
import math

import jax
import jax.numpy as jnp
from jax.experimental import pallas as pl
from jax.experimental.pallas import tpu as pltpu


def _build_pe(max_len: int, d_model: int) -> jnp.ndarray:
    """Positional-encoding table matching the PyTorch module's loop exactly:
       pe[pos, i]   = sin(pos / 10000 ** (2 * i       / d_model))   (even i)
       pe[pos, i+1] = cos(pos / 10000 ** (2 * (i + 1) / d_model))
    (Note: this is the module's own formula, not the canonical transformer one.)
    """
    pos = jnp.arange(max_len, dtype=jnp.float32)[:, None]            # (L, 1)
    i_even = jnp.arange(0, d_model, 2, dtype=jnp.float32)[None, :]   # (1, D/2)
    i_odd = i_even + 1.0                                             # (1, D/2)

    div_even = jnp.power(10000.0, 2.0 * i_even / d_model)
    div_odd = jnp.power(10000.0, 2.0 * i_odd / d_model)

    pe_even = jnp.sin(pos / div_even)                                # (L, D/2)
    pe_odd = jnp.cos(pos / div_odd)                                  # (L, D/2)

    # interleave: columns [0,2,4,...] = sin, [1,3,5,...] = cos
    pe = jnp.stack([pe_even, pe_odd], axis=-1).reshape(max_len, d_model)
    return pe.astype(jnp.float32)


def _pos_enc_kernel(x_ref, pe_ref, o_ref, *, scale):
    # x_ref/o_ref: (TS, D) (batch dim squeezed), pe_ref: (TS, D) f32.
    # Compute in f32, cast on store (no-op for f32 inputs).
    x = x_ref[...].astype(jnp.float32)
    o_ref[...] = (x * scale + pe_ref[...]).astype(o_ref.dtype)


def _choose_seq_tile(S: int, D: int,
                     budget_bytes: int = 24 << 20,
                     max_rows: int = 1024) -> int:
    """Largest sequence-tile (rows) that (a) is a multiple of 8 and divides S
    (or equals S), (b) keeps the double-buffered x/pe/out footprint well under
    a VMEM budget safe on every generation (incl. v7x's 64 MiB)."""
    per_row = 6 * D * 4  # 2x x-in + 2x pe + 2x out buffers, f32-equivalent
    cap = max(8, min(max_rows, budget_bytes // per_row))
    if S <= cap:
        return S                       # full sequence fits in one tile
    ts = (cap // 8) * 8
    while ts >= 8 and S % ts:
        ts -= 8
    return ts if ts >= 8 else S


def positional_encoder(x: jnp.ndarray, pe_full: jnp.ndarray) -> jnp.ndarray:
    """x: (B, S, D); pe_full: (max_len, D) float32. Returns x*sqrt(D) + pe[:S]."""
    B, S, D = x.shape
    scale = float(math.sqrt(D))        # d_model == D, baked as a constant

    pe = pe_full[:S, :]                # (S, D) slice in plain JAX

    TS = _choose_seq_tile(S, D)
    n_seq = S // TS

    kernel = functools.partial(_pos_enc_kernel, scale=scale)

    return pl.pallas_call(
        kernel,
        out_shape=jax.ShapeDtypeStruct((B, S, D), x.dtype),
        # sequence outer, batch inner: pe block index is constant across the
        # inner (batch) steps, so the pe tile stays VMEM-resident / reused.
        grid=(n_seq, B),
        in_specs=[
            # size-1 batch dim squeezed out -> kernel sees lane-dense (TS, D)
            pl.BlockSpec((None, TS, D), lambda si, b: (b, si, 0)),
            pl.BlockSpec((TS, D), lambda si, b: (si, 0)),
        ],
        out_specs=pl.BlockSpec((None, TS, D), lambda si, b: (b, si, 0)),
        compiler_params=pltpu.CompilerParams(
            # both axes are independent -> let megacore (v7x) shard either one
            dimension_semantics=("parallel", "parallel"),
            # big tiles need more than v5e's 16 MiB scoped default; 32 MiB is
            # safe on all generations (v7x: 64 MiB physical).
            vmem_limit_bytes=32 * 1024 * 1024,
        ),
    )(x, pe)


if __name__ == "__main__":
    # Small shapes consistent with the module defaults (d_model=256, max_len=256).
    B, S, D = 2, 64, 256
    MAX_LEN = 256

    key = jax.random.PRNGKey(0)
    x = jax.random.normal(key, (B, S, D), dtype=jnp.float32)

    pe_full = _build_pe(MAX_LEN, D)

    out = positional_encoder(x, pe_full)
    out = jax.block_until_ready(out)

    # Pure-JAX reference check
    ref = x * math.sqrt(D) + pe_full[:S, :][None, :, :]
    assert jnp.allclose(out, ref, atol=1e-5, rtol=1e-5), "mismatch vs reference"

    # TODO(synk): nn.Dropout is constructed in __init__ but never applied in
    # forward, so it is intentionally omitted here.

    print("KERNEL_OK")
</pallas_src>

<mosaic_0001>
module attributes {stable_mosaic.version = 11 : i64} {
  func.func @_pos_enc_kernel(%arg0: i32, %arg1: i32, %arg2: memref<1x64x256xf32, #tpu.memory_space<vmem>>, %arg3: memref<64x256xf32, #tpu.memory_space<vmem>>, %arg4: memref<1x64x256xf32, #tpu.memory_space<vmem>>) attributes {dimension_semantics = [#tpu.dimension_semantics<parallel>, #tpu.dimension_semantics<parallel>], iteration_bounds = array<i64: 1, 2>, scalar_prefetch = 0 : i64, scratch_operands = 0 : i64, tpu.core_type = #tpu.core_type<tc>, window_params = [{transform_indices = @transform_0, window_bounds = array<i64: 1, 64, 256>}, {transform_indices = @transform_1, window_bounds = array<i64: 64, 256>}, {transform_indices = @transform_2, window_bounds = array<i64: 1, 64, 256>}]} {
    %c0 = arith.constant 0 : index
    %c0_0 = arith.constant 0 : index
    %c0_1 = arith.constant 0 : index
    %0 = vector.load %arg2[%c0, %c0_0, %c0_1] : memref<1x64x256xf32, #tpu.memory_space<vmem>>, vector<1x64x256xf32>
    %1 = vector.shape_cast %0 : vector<1x64x256xf32> to vector<64x256xf32>
    %cst = arith.constant 1.600000e+01 : f32
    %2 = vector.broadcast %cst : f32 to vector<64x256xf32>
    %3 = arith.mulf %1, %2 : vector<64x256xf32>
    %c0_2 = arith.constant 0 : index
    %c0_3 = arith.constant 0 : index
    %4 = vector.load %arg3[%c0_2, %c0_3] : memref<64x256xf32, #tpu.memory_space<vmem>>, vector<64x256xf32>
    %5 = arith.addf %3, %4 : vector<64x256xf32>
    %c0_4 = arith.constant 0 : index
    %c0_5 = arith.constant 0 : index
    %c0_6 = arith.constant 0 : index
    %6 = vector.load %arg4[%c0_4, %c0_5, %c0_6] : memref<1x64x256xf32, #tpu.memory_space<vmem>>, vector<1x64x256xf32>
    %7 = vector.shape_cast %6 : vector<1x64x256xf32> to vector<64x256xf32>
    %8 = vector.shape_cast %5 : vector<64x256xf32> to vector<1x64x256xf32>
    tpu.vector_store %arg4[%c0_4, %c0_5, %c0_6], %8 {strides = array<i32>} : memref<1x64x256xf32, #tpu.memory_space<vmem>>, vector<1x64x256xf32>,
    return
  }
  func.func @transform_0(%arg0: i32, %arg1: i32) -> (i32, i32, i32) {
    %c0_i32 = arith.constant 0 : i32
    %c0_i32_0 = arith.constant 0 : i32
    return %arg1, %arg0, %c0_i32 : i32, i32, i32
  }
  func.func @transform_1(%arg0: i32, %arg1: i32) -> (i32, i32) {
    %c0_i32 = arith.constant 0 : i32
    %c0_i32_0 = arith.constant 0 : i32
    return %arg0, %c0_i32 : i32, i32
  }
  func.func @transform_2(%arg0: i32, %arg1: i32) -> (i32, i32, i32) {
    %c0_i32 = arith.constant 0 : i32
    %c0_i32_0 = arith.constant 0 : i32
    return %arg1, %arg0, %c0_i32 : i32, i32, i32
  }
}

</mosaic_0001>

<bundles_post_ra>
// kernel: tpu_custom_call.1
= control target key start
LH: loop header
LB: loop body
LE: loop exit
PB: predicated region body
PF: predicated region fallthrough
CT: control target
= control target key end

     0   :  { %7 = vsyncpa [#allocation3], 0  ;;  %s934_s0 = inlined_call_operand.hbm [shape: f32[2,64,256], index: 0, kind: input, shape index: {}]   ;;  %s935_s1 = inlined_call_operand.hbm [shape: f32[64,256], index: 1, kind: input, shape index: {}]   ;;  %s936_s2 = inlined_call_operand.hbm [shape: f32[2,64,256], index: 2, kind: output, shape index: {}]  }
   0x1   :  { %9 = vsyncpa [#allocation3 + $0x1], 0 }
   0x2   :  { %10 = vsyncpa [#allocation6], 0 }
   0x3   :  { %11 = vsyncpa [#allocation4], 0 }
   0x4   :  { %13 = vsyncpa [#allocation4 + $0x1], 0  ;;  %s668_s9 = smov 0   ;;  %s670_s10 = smov 0  }
   0x5   :  { %s672_s11 = smov 0   ;;  %s674_s12 = smov 0  }
   0x6   :  { %s676_s13 = smov 0   ;;  %s678_s14 = smov 0  }
   0x7 LB: > { %s404_s15 = sadd.s32 4294967295, %s644_s14   ;;  %s405_s16 = sadd.s32 4294967294, %s644_s14   ;;  %s644_s14 = sphi %s678_s14, %s19_s14   ;;  %s640_s13 = sphi %s676_s13, %s960_s13   ;;  %s636_s12 = sphi %s674_s12, %s959_s12   ;;  %s632_s11 = sphi %s672_s11, %s958_s11   ;;  %s628_s10 = sphi %s670_s10, %s957_s10   ;;  %s624_s9 = sphi %s668_s9, %s956_s9  }
   0x8   : > { %p53_p0 = scmp.ne.s32.totalorder %s628_s10, %s624_s9  ;;  %p702_p1 = scmp.eq.s32.totalorder %s404_s15, 0 }
   0x9   : > { %p706_p2 = scmp.eq.s32.totalorder %s404_s15, 1  ;;  %p111_p3 = scmp.eq.s32.totalorder %s405_s16, 1 }
   0xa   : > { %s941_s17 = scalar_select %p702_p1, 1, 0 }
   0xb   : > { %s942_s18 = scalar_select %p706_p2, 1, 0 }
   0xc   : > { %p712_p4 = por %p702_p1, %p53_p0  ;;  %p406_p5 = scmp.ge.s32.totalorder %s644_s14, 1 }
   0xd   : > { %p717_p6 = por %p111_p3, %p53_p0  ;;  %p118_p7 = scmp.lt.s32.totalorder %s644_s14, 3 }
   0xe   : > { %s943_s19 = scalar_select %p712_p4, 1, 0 }
   0xf   : > { %s944_s20 = scalar_select %p717_p6, 1, 0 }
  0x10   : > { %p722_p8 = pnand %p406_p5, %p118_p7  ;;  %s646_s22 = smov [#allocation5]  }
  0x11   : > { %s134_s23 = sshll.u32 %s646_s22, 4  ;;  %s28_s25 = sadd.s32 1, %s640_s13  ;;  %s135_s23 = int_to_ptr.vmem [resolvable:$true] %s134_s23 }
  0x12   : > { %s945_s21 = scalar_select %p722_p8, 1, 0 }
  0x13   : > { %p431_p9 = pneg %p722_p8  ;;  %s500_s28 = scalar_lea.hbm %s935_s1, 2048 }
  0x14   : > { %p501_p12 = scmp.ne.s32.totalorder %s935_s1, %s500_s28  ;;  %p507_p5 = scmp.lt.u32.totalorder %s500_s28, %s935_s1 }
  0x15   : > { %p731_p11 = pnand %p431_p9, %p702_p1 }
  0x17   : > { %p502_p13 = pneg %p731_p11 }
  0x19   : > { %p503_p0 = pnand %p502_p13, %p501_p12 }
  0x1b   : > { %p504_p3 = pneg %p503_p0 }
  0x1d   : > { %p509_p7 = pnand %p507_p5, %p504_p3 }
  0x1f   : > { %512 = shalt.err (!%p509_p7)
}
  0x20   : > { %s513_s5 = scalar_lea.vmem %s135_s23, 2048  ;;  %p521_p1 = scmp.lt.s32.totalorder %s135_s23, %s135_s23 }
  0x21   : > { %p514_p9 = scmp.ne.s32.totalorder %s135_s23, %s513_s5  ;;  %p522_p4 = scmp.lt.s32.totalorder %s513_s5, %s513_s5 }
  0x23   : > { %p516_p10 = pnand %p514_p9, %p502_p13  ;;  %p523_p8 = por %p522_p4, %p521_p1 }
  0x25   : > { %p517_p6 = pneg %p516_p10 }
  0x27   : > { %p524_p2 = pnand %p523_p8, %p517_p6 }
  0x29   : > { %527 = shalt.err (!%p524_p2)
}
  0x2a   : > { %s647_s6 = smov 256   ;;  %s648_s7 = smov 16  }
  0x2b   : > { %434 = dma.hbm_to_vmem [thread:$0]  (!%p731_p11), %s935_s1, 2048, %s135_s23, [#allocation6], %s647_s6, %s647_s6, %s648_s7  }
  0x2c   : > { %p29_p1 = scmp.ge.s32.totalorder %s28_s25, 2  ;;  %s40_s16 = sadd.s32 1, %s632_s11 }
  0x2d   : > { %p47_p2 = scmp.ne.s32.totalorder %s632_s11, %s628_s10  ;;  %p48_p4 = scmp.eq.s32.totalorder %s644_s14, 0 }
  0x2e   : > { %s962_s25 = smov (%p29_p1, %s28_s25), 0  ;;  %p948_p8 = scmp.ne.s32.totalorder %s942_s18, 0 }
  0x2f   : > { %p761_p6 = por %p48_p4, %p47_p2  ;;  %s35_s26 = ssub.s32 %s640_s13, %s962_s25 }
  0x30   : > { %p767_p10 = por %p948_p8, %p47_p2  ;;  %p444_p12 = scmp.lt.s32.totalorder %s644_s14, 2 }
  0x31   : > { %p38_p11 = scmp.eq.s32.totalorder %s35_s26, 0  ;;  %s148_s23 = sand.u32 1, %s632_s11  }
  0x32   : > { %s409_s27 = sshll.u32 %s148_s23, 7  ;;  %s421_s29 = sshll.u32 %s640_s13, 11 }
  0x33   : > { %s776_s28 = scalar_select %p38_p11, %s632_s11, %s40_s16  }
  0x34   : > { %s782_s4 = scalar_lea.hbm %s934_s0, %s421_s29  ;;  %s152_s18 = scalar_lea.vmem [#allocation2], %s409_s27 }
  0x35   : > { %s162_s5 = sshll.u32 %s152_s18, 4  ;;  %p788_p13 = pnand %p444_p12, %p761_p6  ;;  %s784_s5 = int_to_ptr.vmem [resolvable:$true] %s162_s5 }
  0x36   : > { %s792_s15 = scalar_lea.sflag [#allocation3], %s148_s23  ;;  %s528_s16 = scalar_lea.hbm %s782_s4, 2048 }
  0x37   : > { %p529_p0 = scmp.ne.s32.totalorder %s782_s4, %s528_s16  ;;  %p530_p3 = pneg %p788_p13 }
  0x38   : > { %s533_s22 = scalar_lea.hbm %s934_s0, 4096  ;;  %p534_p9 = scmp.lt.u32.totalorder %s782_s4, %s934_s0 }
  0x39   : > { %p531_p5 = pnand %p530_p3, %p529_p0  ;;  %p535_p1 = scmp.lt.u32.totalorder %s533_s22, %s528_s16 }
  0x3a   : > { %p537_p4 = scmp.lt.u32.totalorder %s528_s16, %s782_s4 }
  0x3b   : > { %p532_p7 = pneg %p531_p5  ;;  %p536_p2 = por %p535_p1, %p534_p9 }
  0x3d   : > { %p538_p6 = por %p537_p4, %p536_p2 }
  0x3f   : > { %p539_p8 = pnand %p538_p6, %p532_p7 }
  0x41   : > { %542 = shalt.err (!%p539_p8)
}
  0x42   : > { %s543_s23 = scalar_lea.vmem %s784_s5, 2048  ;;  %s649_s3 = smov [#allocation2]  }
  0x43   : > { %p544_p12 = scmp.ne.s32.totalorder %s784_s5, %s543_s23  ;;  %s548_s18 = sshll.u32 %s649_s3, 4  ;;  %s549_s18 = int_to_ptr.vmem [resolvable:$false] %s548_s18 }
  0x44   : > { %s550_s26 = scalar_lea.vmem %s549_s18, 4096  ;;  %p551_p5 = scmp.lt.s32.totalorder %s784_s5, %s549_s18 }
  0x45   : > { %p546_p11 = pnand %p544_p12, %p530_p3  ;;  %p552_p9 = scmp.lt.s32.totalorder %s550_s26, %s543_s23 }
  0x47   : > { %p547_p0 = pneg %p546_p11  ;;  %p553_p1 = por %p552_p9, %p551_p5 }
  0x49   : > { %p554_p2 = pnand %p553_p1, %p547_p0 }
  0x4b   : > { %557 = shalt.err (!%p554_p2)
}
  0x4c   : > { %438 = dma.hbm_to_vmem [thread:$0]  (!%p788_p13), %s782_s4, 2048, %s784_s5, %s792_s15, %s647_s6, %s647_s6, %s648_s7  }
  0x4d   : > { %p951_p3 = scmp.ne.s32.totalorder %s945_s21, 0 }
  0x4e   : > { %s826_s16 = sand.u32 (!%p951_p3), 1, %s628_s10   ;;  %p952_p7 = scmp.ne.s32.totalorder (!%p951_p3), %s943_s19, 0 }
  0x4f   : > { %174 = sbr.rel (%p951_p3) target bundleno = 120 (0x78), region = 28  ;;  %s413_s27 = sshll.u32 (!%p951_p3), %s826_s16, 7 }
  0x50   : > { %s177_s22 = scalar_lea.sflag (!%p951_p3), [#allocation3], %s826_s16  ;;  %s832_s8 = scalar_lea.vmem (!%p951_p3), [#allocation2], %s413_s27 }
  0x56   : > { %611 = dma.done.wait (%p952_p7), %s177_s22, 2048  }
  0x57   : > { %613 = vsyncadd (%p952_p7), %s177_s22, 4294965248  ;;  %p953_p13 = scmp.ne.s32.totalorder %s941_s17, 0 }
  0x59   : > { %615 = dma.done.wait (%p953_p13), [#allocation6], 2048  }
  0x5a   : > { %617 = vsyncadd (%p953_p13), [#allocation6], 4294965248  ;;  %v208_v0 = vld [vmem:[%s832_s8] sm:$0xff]  ;;  %v209_v2 = vld [vmem:[%s832_s8 + $0x8] sm:$0xff]  ;;  %s852_s17 = scalar_lea.vmem [#allocation7], %s413_s27  ;;  %s422_s19 = sshll.u32 %s636_s12, 11 }
  0x5b   : > { %v240_v1 = vld [vmem:[#allocation5] sm:$0xff]  ;;  %v224_v3 = vmul.f32 16.0, %v208_v0  ;;  %v225_v4 = vmul.f32 16.0, %v209_v2  ;;  %v241_v5 = vld [vmem:[#allocation5 + $0x8] sm:$0xff]  ;;  %v210_v6 = vld [vmem:[%s832_s8 + $0x10] sm:$0xff]  ;;  %s305_s21 = sshll.u32 %s852_s17, 4  ;;  %s879_s7 = scalar_lea.hbm %s936_s2, %s422_s19  ;;  %s881_s21 = int_to_ptr.vmem [resolvable:$true] %s305_s21 }
  0x5c   : > { %v242_v7 = vld [vmem:[#allocation5 + $0x10] sm:$0xff]  ;;  %v226_v8 = vmul.f32 16.0, %v210_v6  ;;  %v211_v9 = vld [vmem:[%s832_s8 + $0x18] sm:$0xff]  ;;  %v212_v11 = vld [vmem:[%s832_s8 + $0x20] sm:$0xff]  ;;  %s289_s4 = scalar_lea.sflag [#allocation4], %s826_s16  ;;  %s558_s5 = scalar_lea.vmem %s881_s21, 2048 }
  0x5d   : > { %v243_v10 = vld [vmem:[#allocation5 + $0x18] sm:$0xff]  ;;  %v256_v12 = vadd.f32 %v240_v1, %v224_v3  ;;  %v257_v13 = vadd.f32 %v241_v5, %v225_v4  ;;  %v227_v14 = vmul.f32 16.0, %v211_v9  ;;  %v228_v15 = vmul.f32 16.0, %v212_v11  ;;  %v244_v16 = vld [vmem:[#allocation5 + $0x20] sm:$0xff]  ;;  %v213_v17 = vld [vmem:[%s832_s8 + $0x28] sm:$0xff]  ;;  %p559_p4 = scmp.ne.s32.totalorder %s881_s21, %s558_s5  ;;  %s650_s15 = smov [#allocation7]  }
  0x5e   : > { %v245_v18 = vld [vmem:[#allocation5 + $0x28] sm:$0xff]  ;;  %v258_v19 = vadd.f32 %v242_v7, %v226_v8  ;;  %v229_v20 = vmul.f32 16.0, %v213_v17  ;;  %v214_v21 = vld [vmem:[%s832_s8 + $0x30] sm:$0xff]  ;;  %v215_v23 = vld [vmem:[%s832_s8 + $0x38] sm:$0xff]  ;;  %s562_s29 = sshll.u32 %s650_s15, 4  ;;  %s563_s29 = int_to_ptr.vmem [resolvable:$false] %s562_s29 }
  0x5f   : > { %v246_v22 = vld [vmem:[#allocation5 + $0x30] sm:$0xff]  ;;  %272 = vst [vmem:[%s852_s17] sm:$0xff] %v256_v12  ;;  %273 = vst [vmem:[%s852_s17 + $0x8] sm:$0xff] %v257_v13  ;;  %v259_v24 = vadd.f32 %v243_v10, %v227_v14  ;;  %v260_v25 = vadd.f32 %v244_v16, %v228_v15  ;;  %v230_v26 = vmul.f32 16.0, %v214_v21  ;;  %v231_v27 = vmul.f32 16.0, %v215_v23  ;;  %v247_v28 = vld [vmem:[#allocation5 + $0x38] sm:$0xff]  ;;  %p560_p6 = pnand %p559_p4, %p767_p10  ;;  %s564_s30 = scalar_lea.vmem %s563_s29, 4096 }
  0x60   : > { %v216_v29 = vld [vmem:[%s832_s8 + $0x40] sm:$0xff]  ;;  %274 = vst [vmem:[%s852_s17 + $0x10] sm:$0xff] %v258_v19  ;;  %v261_v31 = vadd.f32 %v245_v18, %v229_v20  ;;  %v217_v33 = vld [vmem:[%s832_s8 + $0x48] sm:$0xff]  ;;  %v218_v35 = vld [vmem:[%s832_s8 + $0x50] sm:$0xff]  ;;  %p565_p12 = scmp.lt.s32.totalorder %s881_s21, %s563_s29  ;;  %p566_p11 = scmp.lt.s32.totalorder %s564_s30, %s558_s5 }
  0x61   : > { %v248_v30 = vld [vmem:[#allocation5 + $0x40] sm:$0xff]  ;;  %v232_v32 = vmul.f32 16.0, %v216_v29  ;;  %v249_v34 = vld [vmem:[#allocation5 + $0x48] sm:$0xff]  ;;  %275 = vst [vmem:[%s852_s17 + $0x18] sm:$0xff] %v259_v24  ;;  %276 = vst [vmem:[%s852_s17 + $0x20] sm:$0xff] %v260_v25  ;;  %v262_v36 = vadd.f32 %v246_v22, %v230_v26  ;;  %v263_v37 = vadd.f32 %v247_v28, %v231_v27  ;;  %v233_v38 = vmul.f32 16.0, %v217_v33  ;;  %p561_p8 = pneg %p560_p6 }
  0x62   : > { %v234_v39 = vmul.f32 16.0, %v218_v35  ;;  %v250_v40 = vld [vmem:[#allocation5 + $0x50] sm:$0xff]  ;;  %v219_v41 = vld [vmem:[%s832_s8 + $0x58] sm:$0xff]  ;;  %277 = vst [vmem:[%s852_s17 + $0x28] sm:$0xff] %v261_v31  ;;  %v220_v45 = vld [vmem:[%s832_s8 + $0x60] sm:$0xff]  ;;  %p567_p0 = por %p566_p11, %p565_p12 }
  0x63   : > { %v251_v42 = vld [vmem:[#allocation5 + $0x58] sm:$0xff]  ;;  %v264_v43 = vadd.f32 %v248_v30, %v232_v32  ;;  %v235_v44 = vmul.f32 16.0, %v219_v41  ;;  %v252_v46 = vld [vmem:[#allocation5 + $0x60] sm:$0xff]  ;;  %v221_v47 = vld [vmem:[%s832_s8 + $0x68] sm:$0xff]  ;;  %278 = vst [vmem:[%s852_s17 + $0x30] sm:$0xff] %v262_v36  ;;  %v265_v48 = vadd.f32 %v249_v34, %v233_v38  ;;  %v236_v50 = vmul.f32 16.0, %v220_v45 }
  0x64   : > { %279 = vst [vmem:[%s852_s17 + $0x38] sm:$0xff] %v263_v37  ;;  %v266_v49 = vadd.f32 %v250_v40, %v234_v39  ;;  %v237_v51 = vmul.f32 16.0, %v221_v47  ;;  %v253_v52 = vld [vmem:[#allocation5 + $0x68] sm:$0xff]  ;;  %v222_v53 = vld [vmem:[%s832_s8 + $0x70] sm:$0xff]  ;;  %v223_v57 = vld [vmem:[%s832_s8 + $0x78] sm:$0xff]  ;;  %p568_p5 = pnand %p567_p0, %p561_p8 }
  0x65   : > { %v254_v54 = vld [vmem:[#allocation5 + $0x70] sm:$0xff]  ;;  %280 = vst [vmem:[%s852_s17 + $0x40] sm:$0xff] %v264_v43  ;;  %v267_v55 = vadd.f32 %v251_v42, %v235_v44  ;;  %v238_v56 = vmul.f32 16.0, %v222_v53  ;;  %v255_v58 = vld [vmem:[#allocation5 + $0x78] sm:$0xff]  ;;  %281 = vst [vmem:[%s852_s17 + $0x48] sm:$0xff] %v265_v48  ;;  %v268_v59 = vadd.f32 %v252_v46, %v236_v50  ;;  %v239_v61 = vmul.f32 16.0, %v223_v57 }
  0x66   : > { %282 = vst [vmem:[%s852_s17 + $0x50] sm:$0xff] %v266_v49  ;;  %v269_v60 = vadd.f32 %v253_v52, %v237_v51 }
  0x67   : > { %283 = vst [vmem:[%s852_s17 + $0x58] sm:$0xff] %v267_v55  ;;  %v270_v62 = vadd.f32 %v254_v54, %v238_v56  ;;  %284 = vst [vmem:[%s852_s17 + $0x60] sm:$0xff] %v268_v59  ;;  %v271_v63 = vadd.f32 %v255_v58, %v239_v61 }
  0x68   : > { %285 = vst [vmem:[%s852_s17 + $0x68] sm:$0xff] %v269_v60 }
  0x69   : > { %286 = vst [vmem:[%s852_s17 + $0x70] sm:$0xff] %v270_v62  ;;  %287 = vst [vmem:[%s852_s17 + $0x78] sm:$0xff] %v271_v63 }
  0x6a   : > { %571 = shalt.err (!%p568_p5)
}
  0x6b   : > { %s572_s23 = scalar_lea.hbm %s879_s7, 2048  ;;  %s576_s26 = scalar_lea.hbm %s936_s2, 4096 }
  0x6c   : > { %p573_p9 = scmp.ne.s32.totalorder %s879_s7, %s572_s23  ;;  %p577_p3 = scmp.lt.u32.totalorder %s879_s7, %s936_s2 }
  0x6d   : > { %p578_p7 = scmp.lt.u32.totalorder %s576_s26, %s572_s23  ;;  %p580_p4 = scmp.lt.u32.totalorder %s572_s23, %s879_s7 }
  0x6e   : > { %p574_p1 = pnand %p573_p9, %p767_p10 }
  0x6f   : > { %p579_p13 = por %p578_p7, %p577_p3 }
  0x70   : > { %p575_p2 = pneg %p574_p1 }
  0x71   : > { %p581_p6 = por %p580_p4, %p579_p13 }
  0x73   : > { %p582_p8 = pnand %p581_p6, %p575_p2 }
  0x75   : > { %585 = shalt.err (!%p582_p8)
}
  0x76   : > { %s651_s8 = smov 256   ;;  %s652_s17 = smov 16  }
  0x77   : > { %429 = dma.vmem_to_hbm [thread:$0]  (%p767_p10), %s881_s21, 2048, %s879_s7, %s289_s4, %s651_s8, %s651_s8, %s652_s17  }
  0x78 PF: > { %s320_s19 = sand.u32 1, %s624_s9   ;;  %p954_p12 = scmp.ne.s32.totalorder %s944_s20, 0 }
  0x79   : > { %p955_p11 = scmp.ge.s32.totalorder %s644_s14, 2  ;;  %s321_s12 = scalar_lea.sflag [#allocation4], %s320_s19 }
  0x7b   : > { %p440_p0 = pnand %p955_p11, %p954_p12 }
  0x7d   : > { %619 = dma.done.wait (!%p440_p0), %s321_s12, 2048  }
  0x7e   : > { %621 = vsyncadd (!%p440_p0), %s321_s12, 4294965248  ;;  %s19_s14 = sadd.s32 1, %s644_s14   ;;  %s956_s9 = smov %s628_s10 }
  0x7f   : > { %p16_p5 = scmp.ge.s32.totalorder %s19_s14, 4   ;;  %s957_s10 = smov %s632_s11 }
  0x80   : > { %s958_s11 = smov %s776_s28  ;;  %s959_s12 = smov %s640_s13 }
  0x81   : > { %s960_s13 = smov %s962_s25  ;;  %18 = sbr.rel (!%p16_p5) target bundleno = 7 (0x7), region = 78 }
  0x88   :  { %326 = vsyncpa [#allocation3], 1 }
  0x89   :  { %328 = vsyncpa [#allocation3 + $0x1], 1 }
  0x8a   :  { %329 = vsyncpa [#allocation6], 1 }
  0x8b   :  { %330 = vsyncpa [#allocation4], 1 }
  0x8c   :  { %332 = vsyncpa [#allocation4 + $0x1], 1 }

</bundles_post_ra>
